<compile_context>
chip_gen: v6e
topology: v6e:2x2x1
jax: 0.10.0
libtpu: 0.0.40
codegen_flags: <defaults>
</compile_context>

<pallas_src>
import jax
import jax.numpy as jnp
from jax import lax
from jax.experimental import pallas as pl
from jax.experimental.pallas import tpu as pltpu


def _sepconv_matmul_kernel(w_ref, p_ref, o_ref):
    """One lane-tile of the fused separable conv: a single clean MXU matmul.

    w_ref : (Cout, K)          folded depthwise*pointwise weights (bf16)
    p_ref : (K, lane_tile)     lane-dense im2col patch tile (bf16)
    o_ref : (Cout, lane_tile)  f32 output tile
    """
    o_ref[...] = jnp.dot(
        w_ref[...], p_ref[...], preferred_element_type=jnp.float32
    ).astype(o_ref.dtype)


def _pick_lane_tile(L):
    # Multiples of 128 for unmasked full-width stores; prefer >=2 grid steps
    # (v7x megacore) while keeping each tile comfortably inside VMEM.
    if L >= 1024:
        return 512
    if L >= 256:
        return 256
    return 128


def separable_conv2d(x_nchw, dw_weight, pw_weight, *, stride=1, padding=1):
    """Forward pass matching torch SeparableConv2d (bias=False).

    x_nchw   : (N, Cin, H, W)
    dw_weight: (Cin, 1, kh, kw)   torch depthwise conv weight (groups=Cin)
    pw_weight: (Cout, Cin, 1, 1)  torch pointwise conv weight
    returns  : (N, Cout, Ho, Wo)
    """
    N, Cin, H, W = x_nchw.shape
    kh, kw = int(dw_weight.shape[2]), int(dw_weight.shape[3])
    Cout = int(pw_weight.shape[0])
    sh = sw = int(stride)
    p = int(padding)

    Ho = (H + 2 * p - kh) // sh + 1
    Wo = (W + 2 * p - kw) // sw + 1
    K = Cin * kh * kw
    L = N * Ho * Wo
    out_dtype = x_nchw.dtype

    # ---- Fold depthwise into pointwise. Channel-major / tap-minor K ordering to match
    #      lax.conv_general_dilated_patches' output channel layout.
    dw = dw_weight[:, 0, :, :].astype(jnp.float32)            # (Cin, kh, kw)
    pw = pw_weight[:, :, 0, 0].astype(jnp.float32)            # (Cout, Cin)
    w_fold = pw[:, :, None, None] * dw[None, :, :, :]         # (Cout, Cin, kh, kw)
    w_c = w_fold.reshape(Cout, K).astype(jnp.bfloat16)        # (Cout, K)

    # ---- im2col once in the wrapper (XLA). bf16 cast first: patches are pure data
    #      movement (identity-filter conv), so the cast is exact per element.
    patches = lax.conv_general_dilated_patches(
        x_nchw.astype(jnp.bfloat16),
        filter_shape=(kh, kw),
        window_strides=(sh, sw),
        padding=((p, p), (p, p)),
        dimension_numbers=("NCHW", "OIHW", "NCHW"),
    )                                                         # (N, K, Ho, Wo)
    rhs = patches.reshape(N, K, Ho * Wo)
    rhs = jnp.transpose(rhs, (1, 0, 2)).reshape(K, L)         # lane-dense (K, N*Ho*Wo)

    # ---- Lane tiling: 128-multiples (pad if the spatial size doesn't divide).
    lane_tile = _pick_lane_tile(L)
    L_pad = pl.cdiv(L, lane_tile) * lane_tile
    if L_pad != L:
        rhs = jnp.pad(rhs, ((0, 0), (0, L_pad - L)))
    n_tiles = L_pad // lane_tile

    cost = pl.CostEstimate(
        flops=2 * Cout * K * L_pad,
        transcendentals=0,
        bytes_accessed=int(K * L_pad * 2 + Cout * K * 2 + Cout * L_pad * 4),
    )

    out_flat = pl.pallas_call(
        _sepconv_matmul_kernel,
        out_shape=jax.ShapeDtypeStruct((Cout, L_pad), jnp.float32),
        grid_spec=pltpu.PrefetchScalarGridSpec(
            num_scalar_prefetch=0,
            grid=(n_tiles,),
            in_specs=[
                pl.BlockSpec((Cout, K), lambda t: (0, 0)),          # folded weights
                pl.BlockSpec((K, lane_tile), lambda t: (0, t)),     # patch lane tile
            ],
            out_specs=pl.BlockSpec((Cout, lane_tile), lambda t: (0, t)),
        ),
        compiler_params=pltpu.CompilerParams(
            dimension_semantics=("parallel",),
        ),
        cost_estimate=cost,
    )(w_c, rhs)

    # Contiguous un-flatten + cheap NCHW transpose of the (small) output.
    out = out_flat[:, :L].reshape(Cout, N, Ho, Wo)
    return jnp.transpose(out, (1, 0, 2, 3)).astype(out_dtype)


def _reference(x_nchw, dw_weight, pw_weight, stride, padding):
    """Pure-JAX f32 reference (two convs, NCHW, like torch)."""
    Cin = x_nchw.shape[1]
    y = lax.conv_general_dilated(
        x_nchw, dw_weight,
        window_strides=(stride, stride),
        padding=((padding, padding), (padding, padding)),
        feature_group_count=Cin,
        dimension_numbers=("NCHW", "OIHW", "NCHW"),
    )
    y = lax.conv_general_dilated(
        y, pw_weight,
        window_strides=(1, 1),
        padding=((0, 0), (0, 0)),
        dimension_numbers=("NCHW", "OIHW", "NCHW"),
    )
    return y


if __name__ == "__main__":
    # Small config consistent with SeparableConv2d(in=4, out=8, dw_kernel=3, stride=1, pad=1)
    N, Cin, H, W = 2, 4, 16, 16
    Cout = 8
    dw_kernel, dw_stride, dw_padding = 3, 1, 1

    key = jax.random.PRNGKey(0)
    kx, kdw, kpw = jax.random.split(key, 3)

    x = jax.random.normal(kx, (N, Cin, H, W), dtype=jnp.float32)
    dw_weight = jax.random.normal(kdw, (Cin, 1, dw_kernel, dw_kernel), dtype=jnp.float32) * 0.1
    pw_weight = jax.random.normal(kpw, (Cout, Cin, 1, 1), dtype=jnp.float32) * 0.1

    out = separable_conv2d(x, dw_weight, pw_weight,
                           stride=dw_stride, padding=dw_padding)
    out = jax.block_until_ready(out)

    ref = _reference(x, dw_weight, pw_weight, dw_stride, dw_padding)
    assert out.shape == ref.shape == (N, Cout, H, W)
    # bf16 MXU operands + folded-weight accumulation order -> wider tolerance than pure f32.
    err = float(jnp.max(jnp.abs(out - ref)))
    assert jnp.allclose(out, ref, atol=2e-2, rtol=2e-2), f"max abs err {err}"

    print("KERNEL_OK")
</pallas_src>

<mosaic_0001>
module attributes {stable_mosaic.version = 11 : i64} {
  func.func @_sepconv_matmul_kernel(%arg0: i32, %arg1: memref<8x36xbf16, #tpu.memory_space<vmem>>, %arg2: memref<36x256xbf16, #tpu.memory_space<vmem>>, %arg3: memref<8x256xf32, #tpu.memory_space<vmem>>) attributes {dimension_semantics = [#tpu.dimension_semantics<parallel>], iteration_bounds = array<i64: 2>, scalar_prefetch = 0 : i64, scratch_operands = 0 : i64, tpu.core_type = #tpu.core_type<tc>, window_params = [{pipeline_mode = #tpu.pipeline_mode<synchronous>, transform_indices = @transform_0, window_bounds = array<i64: 8, 36>}, {transform_indices = @transform_1, window_bounds = array<i64: 36, 256>}, {transform_indices = @transform_2, window_bounds = array<i64: 8, 256>}]} {
    %c0 = arith.constant 0 : index
    %c0_0 = arith.constant 0 : index
    %0 = vector.load %arg1[%c0, %c0_0] : memref<8x36xbf16, #tpu.memory_space<vmem>>, vector<8x36xbf16>
    %c0_1 = arith.constant 0 : index
    %c0_2 = arith.constant 0 : index
    %1 = vector.load %arg2[%c0_1, %c0_2] : memref<36x256xbf16, #tpu.memory_space<vmem>>, vector<36x256xbf16>
    %cst = arith.constant dense<0.000000e+00> : vector<8x256xf32>
    %2 = tpu.matmul %0, %1, %cst {dimension_numbers = #tpu.dot_dimension_numbers<[1], [0], [0], [1], [0, 0, 1, 1], [], []>} : vector<8x36xbf16>, vector<36x256xbf16>, vector<8x256xf32> -> vector<8x256xf32>
    %c0_3 = arith.constant 0 : index
    %c0_4 = arith.constant 0 : index
    %3 = vector.load %arg3[%c0_3, %c0_4] : memref<8x256xf32, #tpu.memory_space<vmem>>, vector<8x256xf32>
    tpu.vector_store %arg3[%c0_3, %c0_4], %2 {strides = array<i32>} : memref<8x256xf32, #tpu.memory_space<vmem>>, vector<8x256xf32>,
    return
  }
  func.func @transform_0(%arg0: i32) -> (i32, i32) {
    %c0_i32 = arith.constant 0 : i32
    %c0_i32_0 = arith.constant 0 : i32
    %c0_i32_1 = arith.constant 0 : i32
    return %c0_i32, %c0_i32_0 : i32, i32
  }
  func.func @transform_1(%arg0: i32) -> (i32, i32) {
    %c0_i32 = arith.constant 0 : i32
    %c0_i32_0 = arith.constant 0 : i32
    return %c0_i32, %arg0 : i32, i32
  }
  func.func @transform_2(%arg0: i32) -> (i32, i32) {
    %c0_i32 = arith.constant 0 : i32
    %c0_i32_0 = arith.constant 0 : i32
    return %c0_i32, %arg0 : i32, i32
  }
}

</mosaic_0001>

<bundles_post_ra>
// kernel: tpu_custom_call.1
= control target key start
LH: loop header
LB: loop body
LE: loop exit
PB: predicated region body
PF: predicated region fallthrough
CT: control target
= control target key end

     0   :  { %7 = vsyncpa [#allocation3], 0  ;;  %s781_s0 = inlined_call_operand.hbm [shape: bf16[8,36], index: 0, kind: input, shape index: {}]   ;;  %s782_s1 = inlined_call_operand.hbm [shape: bf16[36,512], index: 1, kind: input, shape index: {}]   ;;  %s783_s2 = inlined_call_operand.hbm [shape: f32[8,512], index: 2, kind: output, shape index: {}]  }
   0x1   :  { %8 = vsyncpa [#allocation6], 0 }
   0x2   :  { %10 = vsyncpa [#allocation6 + $0x1], 0 }
   0x3   :  { %11 = vsyncpa [#allocation4], 0 }
   0x4   :  { %13 = vsyncpa [#allocation4 + $0x1], 0  ;;  %s601_s9 = smov 0   ;;  %s603_s10 = smov 0  }
   0x5   :  { %s605_s11 = smov 0   ;;  %s607_s12 = smov 0  }
   0x6 LB: > { %s622_s13 = sadd.s32 4294967295, %s577_s12   ;;  %s360_s14 = sadd.s32 4294967294, %s577_s12   ;;  %s577_s12 = sphi %s607_s12, %s806_s12   ;;  %s573_s11 = sphi %s605_s11, %s805_s11   ;;  %s569_s10 = sphi %s603_s10, %s804_s10   ;;  %s565_s9 = sphi %s601_s9, %s803_s9  }
   0x7   : > { %s626_s15 = sadd.s32 1, %s577_s12   ;;  %s47_s16 = sadd.s32 1, %s573_s11 }
   0x8   : > { %s44_s17 = ssub.s32 %s577_s12, %s626_s15  ;;  %p54_p0 = scmp.ne.s32.totalorder %s573_s11, %s569_s10 }
   0x9   : > { %p45_p1 = scmp.eq.s32.totalorder %s44_s17, 0  ;;  %p55_p2 = scmp.eq.s32.totalorder %s577_s12, 0 }
   0xa   : > { %p60_p3 = scmp.ne.s32.totalorder %s569_s10, %s565_s9  ;;  %p784_p4 = scmp.eq.s32.totalorder %s622_s13, 0 }
   0xb   : > { %s638_s18 = scalar_select %p45_p1, %s573_s11, %s47_s16  }
   0xc   : > { %p640_p5 = por %p55_p2, %p54_p0  ;;  %p646_p6 = por %p784_p4, %p60_p3 }
   0xd   : > { %p84_p7 = scmp.eq.s32.totalorder %s622_s13, 1  ;;  %p90_p8 = scmp.eq.s32.totalorder %s360_s14, 1 }
   0xe   : > { %s789_s20 = scalar_select %p646_p6, 1, 0 }
   0xf   : > { %p361_p9 = scmp.ge.s32.totalorder %s577_s12, 1  ;;  %p97_p10 = scmp.lt.s32.totalorder %s577_s12, 3 }
  0x10   : > { %p653_p11 = por %p84_p7, %p54_p0  ;;  %p657_p12 = por %p90_p8, %p60_p3 }
  0x11   : > { %p661_p13 = pnand %p361_p9, %p97_p10  ;;  %s579_s24 = smov [#allocation2]  }
  0x12   : > { %s790_s21 = scalar_select %p653_p11, 1, 0 }
  0x13   : > { %s791_s22 = scalar_select %p657_p12, 1, 0 }
  0x14   : > { %s792_s23 = scalar_select %p661_p13, 1, 0 }
  0x15   : > { %p394_p2 = pneg %p661_p13  ;;  %s110_s25 = sshll.u32 %s579_s24, 4  ;;  %s111_s25 = int_to_ptr.vmem [resolvable:$true] %s110_s25 }
  0x16   : > { %p407_p4 = scmp.lt.s32.totalorder %s577_s12, 2  ;;  %p793_p0 = scmp.eq.s32.totalorder %s622_s13, 0 }
  0x17   : > { %s121_s27 = sand.u32 1, %s573_s11   ;;  %s466_s30 = scalar_lea.vmem %s111_s25, 64 }
  0x18   : > { %p671_p7 = pnand %p394_p2, %p793_p0  ;;  %p678_p3 = pnand %p407_p4, %p640_p5 }
  0x19   : > { %s384_s29 = smul.u32 40, %s121_s27  ;;  %p467_p9 = scmp.ne.s32.totalorder %s111_s25, %s466_s30 }
  0x1a   : > { %p457_p8 = pneg %p671_p7  ;;  %p474_p12 = scmp.lt.s32.totalorder %s111_s25, %s111_s25 }
  0x1b   : > { %p475_p11 = scmp.lt.s32.totalorder %s466_s30, %s466_s30 }
  0x1c   : > { %p469_p10 = pnand %p467_p9, %p457_p8 }
  0x1d   : > { %p476_p2 = por %p475_p11, %p474_p12 }
  0x1e   : > { %p470_p1 = pneg %p469_p10 }
  0x20   : > { %p477_p0 = pnand %p476_p2, %p470_p1 }
  0x22   : > { %480 = shalt.err (!%p477_p0)
}
  0x23   : > { %397 = dma.hbm_to_vmem [thread:$0]  (!%p671_p7), %s781_s0, 64, %s111_s25, [#allocation3]  }
  0x24   : > { %s382_s5 = sshll.u32 %s577_s12, 7  ;;  %s125_s6 = scalar_lea.vmem [#allocation5], %s384_s29 }
  0x25   : > { %s132_s7 = sshll.u32 %s125_s6, 4  ;;  %s693_s16 = scalar_lea.hbm %s782_s1, %s382_s5  ;;  %s695_s7 = int_to_ptr.vmem [resolvable:$true] %s132_s7 }
  0x26   : > { %s697_s17 = scalar_lea.sflag [#allocation6], %s121_s27  ;;  %s481_s19 = scalar_lea.hbm %s693_s16, 640 }
  0x27   : > { %p482_p4 = scmp.ne.s32.totalorder %s693_s16, %s481_s19  ;;  %p483_p5 = pneg %p678_p3 }
  0x28   : > { %s486_s26 = scalar_lea.hbm %s782_s1, 1280  ;;  %p487_p1 = scmp.lt.s32.totalorder %s693_s16, %s782_s1 }
  0x29   : > { %p484_p11 = pnand %p483_p5, %p482_p4  ;;  %p488_p7 = scmp.lt.s32.totalorder %s486_s26, %s481_s19 }
  0x2b   : > { %p485_p12 = pneg %p484_p11  ;;  %p489_p8 = por %p488_p7, %p487_p1 }
  0x2d   : > { %p490_p9 = pnand %p489_p8, %p485_p12 }
  0x2f   : > { %493 = shalt.err (!%p490_p9)
}
  0x30   : > { %s494_s27 = scalar_lea.vmem %s695_s7, 640  ;;  %s580_s3 = smov [#allocation5]  }
  0x31   : > { %p495_p10 = scmp.ne.s32.totalorder %s695_s7, %s494_s27  ;;  %s499_s4 = sshll.u32 %s580_s3, 4  ;;  %s500_s4 = int_to_ptr.vmem [resolvable:$false] %s499_s4 }
  0x32   : > { %s501_s5 = scalar_lea.vmem %s500_s4, 1280  ;;  %p502_p4 = scmp.lt.s32.totalorder %s695_s7, %s500_s4 }
  0x33   : > { %p497_p2 = pnand %p495_p10, %p483_p5  ;;  %p503_p11 = scmp.lt.s32.totalorder %s501_s5, %s494_s27 }
  0x35   : > { %p498_p0 = pneg %p497_p2  ;;  %p504_p6 = por %p503_p11, %p502_p4 }
  0x37   : > { %p505_p13 = pnand %p504_p6, %p498_p0 }
  0x39   : > { %508 = shalt.err (!%p505_p13)
}
  0x3a   : > { %s581_s6 = smov 256   ;;  %s582_s8 = smov 128  }
  0x3b   : > { %s583_s14 = smov 8   ;;  %p796_p5 = scmp.ne.s32.totalorder %s792_s23, 0 }
  0x3c   : > { %401 = dma.hbm_to_vmem [thread:$0]  (!%p678_p3), %s693_s16, 640, %s695_s7, %s697_s17, %s581_s6, %s582_s8, %s583_s14  }
  0x3d   : > { %144 = sbr.rel (%p796_p5) target bundleno = 296 (0x128), region = 28  ;;  %p797_p12 = scmp.eq.s32.totalorder (!%p796_p5), %s622_s13, 0 }
  0x42   : > { %552 = dma.done.wait (%p797_p12), [#allocation3], 64   ;;  %p798_p1 = pmov %p797_p12 }
  0x43   : > { %s725_s19 = sand.u32 1, %s569_s10   ;;  %p799_p6 = scmp.ne.s32.totalorder %s789_s20, 0 }
  0x44   : > { %554 = vsyncadd (%p798_p1), [#allocation3], 4294967232  ;;  %s385_s24 = smul.u32 40, %s725_s19  ;;  %s151_s25 = scalar_lea.sflag [#allocation6], %s725_s19 }
  0x46   : > { %s154_s26 = scalar_lea.vmem [#allocation5], %s385_s24 }
  0x47   : > { %556 = dma.done.wait (%p799_p6), %s151_s25, 640  }
  0x48   : > { %558 = vsyncadd (%p799_p6), %s151_s25, 4294966656  ;;  %v584_v0 = vmov 0   ;;  %v183_v1 = vld [vmem:[%s154_s26 + $0x20] sm:$0x33]  ;;  %vm213_vm0 = vcmask 1041408   ;;  %vm209_vm1 = vcmask 293888  }
  0x49   : > { %252 = vmatprep.mubr.bf16.mxu0 %v584_v0  ;;  %v374_v2 = vcombine.high %v183_v1, %v183_v1  ;;  %v373_v3 = vcombine.low %v183_v1, %v183_v1  ;;  %v449_v4 = vld [vmem:[%s154_s26 + $0x14] ss:$8 sps:$4 sm:$0xff]   ;;  %v451_v6 = vld [vmem:[%s154_s26 + $0x10] ss:$8 sps:$4 sm:$0xff]   ;;  %v452_v7 = vld [vmem:[%s154_s26 + $0x4] ss:$8 sps:$4 sm:$0xff]  }
  0x4a   : > { %v454_v8 = vld [vmem:[%s154_s26] ss:$8 sps:$4 sm:$0xff]   ;;  %v178_v9 = vld [vmem:[#allocation2] sm:$0xf]  ;;  %s368_s20 = sshll.u32 %s725_s19, 4  ;;  %s383_s7 = sshll.u32 %s622_s13, 8 }
  0x4b   : > { %375 = vmatprep.subr.msk.bf16.mxu0 %vm213_vm0, %v374_v2  ;;  %v215_v5 = vsel %vm213_vm0, %v373_v3, 0  ;;  %s174_s23 = scalar_lea.vmem [#allocation7], %s368_s20  ;;  %s740_s29 = scalar_lea.hbm %s783_s2, %s383_s7 }
  0x4c   : > { %231 = vmatpush1.bf16.msra.mxu0 %v215_v5  ;;  %s278_s28 = sshll.u32 %s174_s23, 4  ;;  %s264_s30 = scalar_lea.sflag [#allocation4], %s725_s19  ;;  %s735_s28 = int_to_ptr.vmem [resolvable:$true] %s278_s28 }
  0x4d   : > { %232 = vmatprep.subr.bf16.mxu0 %v449_v4  ;;  %s509_s27 = scalar_lea.vmem %s735_s28, 256  ;;  %p800_p3 = scmp.ne.s32.totalorder %s790_s21, 0 }
  0x4e   : > { %p510_p13 = scmp.ne.s32.totalorder %s735_s28, %s509_s27  ;;  %s585_s13 = smov [#allocation7]  }
  0x4f   : > { %s513_s3 = sshll.u32 %s585_s13, 4  ;;  %s514_s3 = int_to_ptr.vmem [resolvable:$false] %s513_s3 }
  0x50   : > { %233 = vmatpush1.bf16.msra.mxu0 %v451_v6  ;;  %p511_p7 = pnand %p510_p13, %p800_p3  ;;  %s515_s4 = scalar_lea.vmem %s514_s3, 512 }
  0x51   : > { %234 = vmatprep.subr.bf16.mxu0 %v452_v7  ;;  %p516_p9 = scmp.lt.s32.totalorder %s735_s28, %s514_s3  ;;  %p517_p10 = scmp.lt.s32.totalorder %s515_s4, %s509_s27 }
  0x52   : > { %p512_p8 = pneg %p511_p7 }
  0x53   : > { %p518_p2 = por %p517_p10, %p516_p9 }
  0x54   : > { %235 = vmatpush1.bf16.msra.mxu0 %v454_v8 }
  0x55   : > { %p519_p0 = pnand %p518_p2, %p512_p8 }
  0x57   : > { %376 = vmatmul.mubr.msk.bf16.vlgmr.msra.gmra.mxu0 %vm209_vm1, %v178_v9 }
 0x117   : > { %v254_v10 = vpop.f32.mrf.mxu0 }
 0x118   : > { %261 = vst [vmem:[%s174_s23] sm:$0xff] %v254_v10 }
 0x119   : > { %v256_v11 = vpop.f32.mrf.mxu0 }
 0x11a   : > { %262 = vst [vmem:[%s174_s23 + $0x8] sm:$0xff] %v256_v11 }
 0x11b   : > { %v258_v12 = vpop.f32.mrf.mxu0 }
 0x11c   : > { %522 = shalt.err (!%p519_p0)
}
 0x11d   : > { %s523_s5 = scalar_lea.hbm %s740_s29, 256  ;;  %s527_s14 = scalar_lea.hbm %s783_s2, 512 }
 0x11e   : > { %p524_p4 = scmp.ne.s32.totalorder %s740_s29, %s523_s5  ;;  %p528_p12 = scmp.lt.s32.totalorder %s740_s29, %s783_s2 }
 0x11f   : > { %p529_p1 = scmp.lt.s32.totalorder %s527_s14, %s523_s5 }
 0x120   : > { %p525_p11 = pnand %p524_p4, %p800_p3 }
 0x121   : > { %p530_p6 = por %p529_p1, %p528_p12 }
 0x122   : > { %p526_p5 = pneg %p525_p11 }
 0x124   : > { %p531_p13 = pnand %p530_p6, %p526_p5 }
 0x126   : > { %534 = shalt.err (!%p531_p13)
}
 0x127   : > { %392 = dma.vmem_to_hbm [thread:$0]  (%p800_p3), %s735_s28, 256, %s740_s29, %s264_s30   ;;  %v259_v13 = vpop.f32.mrf.mxu0 }
 0x128 PF: > { %s290_s25 = sand.u32 1, %s565_s9   ;;  %p801_p7 = scmp.ne.s32.totalorder %s791_s22, 0 }
 0x129   : > { %p802_p8 = scmp.ge.s32.totalorder %s577_s12, 2  ;;  %s291_s26 = scalar_lea.sflag [#allocation4], %s290_s25 }
 0x12b   : > { %p403_p9 = pnand %p802_p8, %p801_p7 }
 0x12d   : > { %p404_p10 = pneg %p403_p9 }
 0x12f   : > { %560 = dma.done.wait (%p404_p10), %s291_s26, 256  }
 0x130   : > { %562 = vsyncadd (%p404_p10), %s291_s26, 4294967040  ;;  %p16_p2 = scmp.ge.s32.totalorder %s626_s15, 4   ;;  %s803_s9 = smov %s569_s10 }
 0x131   : > { %s804_s10 = smov %s573_s11  ;;  %s805_s11 = smov %s638_s18 }
 0x132   : > { %s806_s12 = smov %s626_s15  ;;  %18 = sbr.rel (!%p16_p2) target bundleno = 6 (0x6), region = 78 }
 0x137   :  { %296 = vsyncpa [#allocation3], 1 }
 0x138   :  { %298 = vsyncpa [#allocation3 + $0x1], 1 }
 0x139   :  { %299 = vsyncpa [#allocation6], 1 }
 0x13a   :  { %301 = vsyncpa [#allocation6 + $0x1], 1 }
 0x13b   :  { %302 = vsyncpa [#allocation4], 1 }
 0x13c   :  { %304 = vsyncpa [#allocation4 + $0x1], 1 }

</bundles_post_ra>
